<compile_context>
chip_gen: v7x
topology: tpu7x:2x2x1
jax: 0.10.0
libtpu: 0.0.40
codegen_flags: <defaults>
</compile_context>

<pallas_src>
import jax
import jax.numpy as jnp
import numpy as np
from jax.experimental import pallas as pl
from jax.experimental.pallas import tpu as pltpu

_SQRT_2_OVER_PI = 0.7978845608028654
_GELU_C = 0.044715


def _gelu_tanh(x):
    # tanh-form GELU: tanh goes to the EUP slot, the rest is ~6 VALU ops/elem.
    return 0.5 * x * (1.0 + jnp.tanh(_SQRT_2_OVER_PI * (x + _GELU_C * x * x * x)))


# ----------------------------------------------------------------------------
# Kernel: one (Cin, tile_s) column-slab of one batch item per grid step.
# Weights/biases are small constant-index blocks resident in VMEM.
# ----------------------------------------------------------------------------
def cmlp_kernel(x_ref, w1_ref, b1_ref, w2_ref, b2_ref, o_ref):
    # x_ref : (Cin,  ts)  input dtype    w1_ref: (Hid, Cin)  bf16   b1_ref: (Hid, 1)  f32
    # w2_ref: (Cout, Hid) bf16           b2_ref: (Cout, 1)   f32    o_ref : (Cout, ts)
    x = x_ref[...].astype(jnp.bfloat16)
    h = jnp.dot(w1_ref[...], x, preferred_element_type=jnp.float32)
    h = _gelu_tanh(h + b1_ref[...])                      # bias lane-broadcast, f32 epilogue
    y = jnp.dot(w2_ref[...], h.astype(jnp.bfloat16),
                preferred_element_type=jnp.float32)
    o_ref[...] = (y + b2_ref[...]).astype(o_ref.dtype)


def _round_up(n, m):
    return (n + m - 1) // m * m


def _choose_spatial_tile(S, B, cin, hid, cout, x_itemsize, out_itemsize,
                         tile_s=None, vmem_budget_bytes=20 << 20):
    """Spatial (lane) tile: big enough to hide per-step overhead, small enough
    for VMEM (incl. v7x 64 MiB) and to leave >= ~4 grid steps when possible."""
    Sp = _round_up(S, 128)
    # Per-lane working set: double-buffered x / out blocks + f32 hidden
    # intermediate + its bf16 copy feeding the second matmul.
    bytes_per_lane = 2 * x_itemsize * cin + 2 * out_itemsize * cout + 6 * hid
    cap = (vmem_budget_bytes // max(bytes_per_lane, 1)) // 128 * 128
    ts = 2048 if tile_s is None else tile_s
    ts = min(ts, cap, Sp)
    ts = max(128, (ts // 128) * 128)
    # >= ~4 total grid steps (2 per v7x TensorCore; >=2-3 for v5e/v6e pipelining).
    want_s_tiles = max(1, pl.cdiv(4, B))
    while ts > 128 and Sp // ts < want_s_tiles:
        ts -= 128
    Sp = _round_up(Sp, ts)
    return ts, Sp


# ----------------------------------------------------------------------------
# Wrapper: NCHW in / NCHW out (matching the PyTorch module interface), no
# transposes — only free contiguous reshapes (and a spatial pad when H*W is
# not a multiple of 128).
# ----------------------------------------------------------------------------
def cmlp_pallas(x_nchw, kparams, *, tile_s=None, out_dtype=jnp.bfloat16):
    B, Cin, H, W = x_nchw.shape
    w1, b1, w2, b2 = kparams["w1"], kparams["b1"], kparams["w2"], kparams["b2"]
    Hid, Cout = w1.shape[0], w2.shape[0]
    S = H * W

    ts, Sp = _choose_spatial_tile(
        S, B, Cin, Hid, Cout,
        x_itemsize=x_nchw.dtype.itemsize,
        out_itemsize=np.dtype(out_dtype).itemsize,
        tile_s=tile_s)

    x3d = x_nchw.reshape(B, Cin, S)              # contiguous reshape, no data movement
    if Sp != S:
        x3d = jnp.pad(x3d, ((0, 0), (0, 0), (0, Sp - S)))

    out = pl.pallas_call(
        cmlp_kernel,
        out_shape=jax.ShapeDtypeStruct((B, Cout, Sp), out_dtype),
        grid=(B, Sp // ts),
        in_specs=[
            pl.BlockSpec((None, Cin, ts), lambda b, s: (b, 0, s)),   # x slab
            pl.BlockSpec((Hid, Cin), lambda b, s: (0, 0)),           # w1 (resident)
            pl.BlockSpec((Hid, 1), lambda b, s: (0, 0)),             # b1
            pl.BlockSpec((Cout, Hid), lambda b, s: (0, 0)),          # w2 (resident)
            pl.BlockSpec((Cout, 1), lambda b, s: (0, 0)),            # b2
        ],
        out_specs=pl.BlockSpec((None, Cout, ts), lambda b, s: (b, 0, s)),
        compiler_params=pltpu.CompilerParams(
            dimension_semantics=("parallel", "parallel"),
            vmem_limit_bytes=32 << 20,
        ),
    )(x3d, w1, b1, w2, b2)

    if Sp != S:
        out = out[:, :, :S]
    return out.reshape(B, Cout, H, W)


# ----------------------------------------------------------------------------
# Deterministic parameter construction (Conv2d-style 1/sqrt(fan_in) uniform),
# kept in the PyTorch (out, in) layout, f32 — used by the reference.
# ----------------------------------------------------------------------------
def init_params(key, in_features, hidden_features=None, out_features=None):
    hidden_features = hidden_features or in_features
    out_features = out_features or in_features
    k1, k2, k3, k4 = jax.random.split(key, 4)
    s1 = 1.0 / np.sqrt(in_features)
    s2 = 1.0 / np.sqrt(hidden_features)
    return {
        "w1": jax.random.uniform(k1, (hidden_features, in_features), jnp.float32, -s1, s1),
        "b1": jax.random.uniform(k2, (hidden_features,), jnp.float32, -s1, s1),
        "w2": jax.random.uniform(k3, (out_features, hidden_features), jnp.float32, -s2, s2),
        "b2": jax.random.uniform(k4, (out_features,), jnp.float32, -s2, s2),
    }


def prepare_params(params):
    """One-time repack for the kernel: bf16 weights, (C, 1) f32 biases."""
    return {
        "w1": params["w1"].astype(jnp.bfloat16),
        "b1": params["b1"].astype(jnp.float32).reshape(-1, 1),
        "w2": params["w2"].astype(jnp.bfloat16),
        "b2": params["b2"].astype(jnp.float32).reshape(-1, 1),
    }


# ----------------------------------------------------------------------------
# Pure-JAX f32 reference (mirrors CMlp.forward; Dropout(p=0) is the identity).
# ----------------------------------------------------------------------------
def ref_forward(x_nchw, P):
    B, C, H, W = x_nchw.shape
    x = x_nchw.reshape(B, C, H * W).astype(jnp.float32)
    h = jnp.einsum("hc,bcs->bhs", P["w1"], x) + P["b1"][None, :, None]
    h = jax.nn.gelu(h, approximate=False)
    y = jnp.einsum("oh,bhs->bos", P["w2"], h) + P["b2"][None, :, None]
    return y.reshape(B, -1, H, W)


if __name__ == "__main__":
    key = jax.random.PRNGKey(0)
    kx, kp = jax.random.split(key)
    B, C, H, W = 2, 4, 16, 16
    hidden = 32

    x = jax.random.normal(kx, (B, C, H, W), jnp.float32)
    params = init_params(kp, C, hidden_features=hidden)
    kparams = prepare_params(params)          # cast/reshape weights once, not per call

    out = jax.block_until_ready(cmlp_pallas(x, kparams))
    ref = jax.block_until_ready(ref_forward(x, params))

    # bf16 MXU operands + bf16 writeback + tanh-GELU vs. the exact-erf f32 ref.
    np.testing.assert_allclose(np.asarray(out.astype(jnp.float32)), np.asarray(ref),
                               rtol=3e-2, atol=3e-2)
    print("KERNEL_OK")
</pallas_src>

<mosaic_0001>
module attributes {stable_mosaic.version = 11 : i64} {
  func.func @cmlp_kernel(%arg0: i32, %arg1: i32, %arg2: memref<1x4x128xf32, #tpu.memory_space<vmem>>, %arg3: memref<32x4xbf16, #tpu.memory_space<vmem>>, %arg4: memref<32x1xf32, #tpu.memory_space<vmem>>, %arg5: memref<4x32xbf16, #tpu.memory_space<vmem>>, %arg6: memref<4x1xf32, #tpu.memory_space<vmem>>, %arg7: memref<1x4x128xbf16, #tpu.memory_space<vmem>>) attributes {dimension_semantics = [#tpu.dimension_semantics<parallel>, #tpu.dimension_semantics<parallel>], iteration_bounds = array<i64: 2, 2>, scalar_prefetch = 0 : i64, scratch_operands = 0 : i64, tpu.core_type = #tpu.core_type<tc>, window_params = [{transform_indices = @transform_0, window_bounds = array<i64: 1, 4, 128>}, {pipeline_mode = #tpu.pipeline_mode<synchronous>, transform_indices = @transform_1, window_bounds = array<i64: 32, 4>}, {pipeline_mode = #tpu.pipeline_mode<synchronous>, transform_indices = @transform_2, window_bounds = array<i64: 32, 1>}, {pipeline_mode = #tpu.pipeline_mode<synchronous>, transform_indices = @transform_3, window_bounds = array<i64: 4, 32>}, {pipeline_mode = #tpu.pipeline_mode<synchronous>, transform_indices = @transform_4, window_bounds = array<i64: 4, 1>}, {transform_indices = @transform_5, window_bounds = array<i64: 1, 4, 128>}]} {
    %c0 = arith.constant 0 : index
    %c0_0 = arith.constant 0 : index
    %c0_1 = arith.constant 0 : index
    %0 = vector.load %arg2[%c0, %c0_0, %c0_1] : memref<1x4x128xf32, #tpu.memory_space<vmem>>, vector<1x4x128xf32>
    %1 = vector.shape_cast %0 : vector<1x4x128xf32> to vector<4x128xf32>
    %2 = arith.truncf %1 : vector<4x128xf32> to vector<4x128xbf16>
    %c0_2 = arith.constant 0 : index
    %c0_3 = arith.constant 0 : index
    %3 = vector.load %arg3[%c0_2, %c0_3] : memref<32x4xbf16, #tpu.memory_space<vmem>>, vector<32x4xbf16>
    %cst = arith.constant dense<0.000000e+00> : vector<32x128xf32>
    %4 = tpu.matmul %3, %2, %cst {dimension_numbers = #tpu.dot_dimension_numbers<[1], [0], [0], [1], [0, 0, 1, 1], [], []>} : vector<32x4xbf16>, vector<4x128xbf16>, vector<32x128xf32> -> vector<32x128xf32>
    %c0_4 = arith.constant 0 : index
    %c0_5 = arith.constant 0 : index
    %5 = vector.load %arg4[%c0_4, %c0_5] : memref<32x1xf32, #tpu.memory_space<vmem>>, vector<32x1xf32>
    %6 = vector.broadcast %5 : vector<32x1xf32> to vector<32x128xf32>
    %7 = arith.addf %4, %6 : vector<32x128xf32>
    %cst_6 = arith.constant 5.000000e-01 : f32
    %8 = vector.broadcast %cst_6 : f32 to vector<32x128xf32>
    %9 = arith.mulf %8, %7 : vector<32x128xf32>
    %cst_7 = arith.constant 4.471500e-02 : f32
    %10 = vector.broadcast %cst_7 : f32 to vector<32x128xf32>
    %11 = arith.mulf %10, %7 : vector<32x128xf32>
    %12 = arith.mulf %11, %7 : vector<32x128xf32>
    %13 = arith.mulf %12, %7 : vector<32x128xf32>
    %14 = arith.addf %7, %13 : vector<32x128xf32>
    %cst_8 = arith.constant 0.797884583 : f32
    %15 = vector.broadcast %cst_8 : f32 to vector<32x128xf32>
    %16 = arith.mulf %15, %14 : vector<32x128xf32>
    %17 = math.tanh %16 : vector<32x128xf32>
    %cst_9 = arith.constant 1.000000e+00 : f32
    %18 = vector.broadcast %cst_9 : f32 to vector<32x128xf32>
    %19 = arith.addf %18, %17 : vector<32x128xf32>
    %20 = arith.mulf %9, %19 : vector<32x128xf32>
    %c0_10 = arith.constant 0 : index
    %c0_11 = arith.constant 0 : index
    %21 = vector.load %arg5[%c0_10, %c0_11] : memref<4x32xbf16, #tpu.memory_space<vmem>>, vector<4x32xbf16>
    %22 = arith.truncf %20 : vector<32x128xf32> to vector<32x128xbf16>
    %cst_12 = arith.constant dense<0.000000e+00> : vector<4x128xf32>
    %23 = tpu.matmul %21, %22, %cst_12 {dimension_numbers = #tpu.dot_dimension_numbers<[1], [0], [0], [1], [0, 0, 1, 1], [], []>} : vector<4x32xbf16>, vector<32x128xbf16>, vector<4x128xf32> -> vector<4x128xf32>
    %c0_13 = arith.constant 0 : index
    %c0_14 = arith.constant 0 : index
    %24 = vector.load %arg6[%c0_13, %c0_14] : memref<4x1xf32, #tpu.memory_space<vmem>>, vector<4x1xf32>
    %25 = vector.broadcast %24 : vector<4x1xf32> to vector<4x128xf32>
    %26 = arith.addf %23, %25 : vector<4x128xf32>
    %27 = arith.truncf %26 : vector<4x128xf32> to vector<4x128xbf16>
    %c0_15 = arith.constant 0 : index
    %c0_16 = arith.constant 0 : index
    %c0_17 = arith.constant 0 : index
    %28 = vector.load %arg7[%c0_15, %c0_16, %c0_17] : memref<1x4x128xbf16, #tpu.memory_space<vmem>>, vector<1x4x128xbf16>
    %29 = vector.shape_cast %28 : vector<1x4x128xbf16> to vector<4x128xbf16>
    %30 = vector.shape_cast %27 : vector<4x128xbf16> to vector<1x4x128xbf16>
    tpu.vector_store %arg7[%c0_15, %c0_16, %c0_17], %30 {strides = array<i32>} : memref<1x4x128xbf16, #tpu.memory_space<vmem>>, vector<1x4x128xbf16>,
    return
  }
  func.func @transform_0(%arg0: i32, %arg1: i32) -> (i32, i32, i32) {
    %c0_i32 = arith.constant 0 : i32
    %c0_i32_0 = arith.constant 0 : i32
    return %arg0, %c0_i32, %arg1 : i32, i32, i32
  }
  func.func @transform_1(%arg0: i32, %arg1: i32) -> (i32, i32) {
    %c0_i32 = arith.constant 0 : i32
    %c0_i32_0 = arith.constant 0 : i32
    %c0_i32_1 = arith.constant 0 : i32
    return %c0_i32, %c0_i32_0 : i32, i32
  }
  func.func @transform_2(%arg0: i32, %arg1: i32) -> (i32, i32) {
    %c0_i32 = arith.constant 0 : i32
    %c0_i32_0 = arith.constant 0 : i32
    %c0_i32_1 = arith.constant 0 : i32
    return %c0_i32, %c0_i32_0 : i32, i32
  }
  func.func @transform_3(%arg0: i32, %arg1: i32) -> (i32, i32) {
    %c0_i32 = arith.constant 0 : i32
    %c0_i32_0 = arith.constant 0 : i32
    %c0_i32_1 = arith.constant 0 : i32
    return %c0_i32, %c0_i32_0 : i32, i32
  }
  func.func @transform_4(%arg0: i32, %arg1: i32) -> (i32, i32) {
    %c0_i32 = arith.constant 0 : i32
    %c0_i32_0 = arith.constant 0 : i32
    %c0_i32_1 = arith.constant 0 : i32
    return %c0_i32, %c0_i32_0 : i32, i32
  }
  func.func @transform_5(%arg0: i32, %arg1: i32) -> (i32, i32, i32) {
    %c0_i32 = arith.constant 0 : i32
    %c0_i32_0 = arith.constant 0 : i32
    return %arg0, %c0_i32, %arg1 : i32, i32, i32
  }
}

</mosaic_0001>

<bundles_post_ra>
// kernel: tpu_custom_call.1
= control target key start
LH: loop header
LB: loop body
LE: loop exit
PB: predicated region body
PF: predicated region fallthrough
CT: control target
= control target key end

     0   :  { %10 = vsyncpa [#allocation3], 0  ;;  %s952_s0 = inlined_call_operand.vmem [shape: f32[2,4,256], index: 0, kind: input, shape index: {}]   ;;  %s953_s1 = inlined_call_operand.vmem [shape: bf16[32,4], index: 1, kind: input, shape index: {}]   ;;  %s954_s2 = inlined_call_operand.vmem [shape: f32[32,1], index: 2, kind: input, shape index: {}]   ;;  %s955_s3 = inlined_call_operand.vmem [shape: bf16[4,32], index: 3, kind: input, shape index: {}]   ;;  %s956_s4 = inlined_call_operand.vmem [shape: f32[4,1], index: 4, kind: input, shape index: {}]   ;;  %s957_s5 = inlined_call_operand.hbm [shape: bf16[2,4,256], index: 5, kind: output, shape index: {}]  }
   0x1   :  { %12 = vsyncpa [#allocation3 + $0x1], 0  ;;  %s789_s18 = smov 0   ;;  %s791_s19 = smov 0  }
   0x2   :  { %s793_s20 = smov 0   ;;  %s795_s21 = smov 0  }
   0x3   :  { %s797_s22 = smov 0   ;;  %s799_s23 = smov 0  }
   0x4   :  { %s801_s24 = smov 0   ;;  %s803_s25 = smov 0  }
   0x5 LB: > { %s534_s26 = sadd.s32 4294967295, %s753_s25   ;;  %s535_s27 = sadd.s32 4294967294, %s753_s25   ;;  %s753_s25 = sphi %s803_s25, %s18_s25   ;;  %s749_s24 = sphi %s801_s24, %s972_s24   ;;  %s745_s23 = sphi %s799_s23, %s971_s23   ;;  %s741_s22 = sphi %s797_s22, %s970_s22   ;;  %s737_s21 = sphi %s795_s21, %s969_s21   ;;  %s733_s20 = sphi %s793_s20, %s968_s20   ;;  %s729_s19 = sphi %s791_s19, %s967_s19   ;;  %s725_s18 = sphi %s789_s18, %s966_s18  }
   0x6   : > { %s27_s28 = sadd.s32 1, %s745_s23  ;;  %s30_s29 = sadd.s32 1, %s749_s24 }
   0x7   : > { %p28_p0 = scmp.ge.s32.totalorder %s27_s28, 2  ;;  %p161_p1 = scmp.ne.s32.totalorder %s733_s20, %s729_s19 }
   0x8   : > { %p162_p2 = scmp.eq.s32.totalorder %s534_s26, 3  ;;  %p167_p5 = scmp.ne.s32.totalorder %s729_s19, %s725_s18 }
   0x9   : > { %s974_s28 = smov (%p28_p0, %s27_s28), 0  ;;  %s976_s29 = smov (!%p28_p0, %s30_s29), %s749_s24 }
   0xa   : > { %960 = sst [smem:[#allocation5_spill]] %s974_s28  ;;  %s147_s30 = ssub.s32 %s745_s23, %s974_s28 }
   0xb   : > { %p840_p3 = por %p162_p2, %p161_p1  ;;  %p32_p4 = scmp.ge.s32.totalorder %s976_s29, 2 }
   0xc   : > { %p168_p6 = scmp.eq.s32.totalorder %s535_s27, 3  ;;  %p538_p7 = scmp.ge.s32.totalorder %s753_s25, 1 }
   0xd   : > { %s978_s29 = smov (%p32_p4, %s976_s29), 0  ;;  %p209_p9 = scmp.lt.s32.totalorder %s753_s25, 5 }
   0xe   : > { %962 = sst [smem:[#allocation6_spill]] %s978_s29  ;;  %p849_p8 = por %p168_p6, %p167_p5 }
   0xf   : > { %s146_s8 = ssub.s32 %s749_s24, %s978_s29  ;;  %s151_s9 = sadd.s32 1, %s733_s20 }
  0x10   : > { %s148_s10 = sor.u32 %s147_s30, %s146_s8  ;;  %p210_p10 = pnand %p538_p7, %p209_p9 }
  0x11   : > { %p149_p11 = scmp.eq.s32.totalorder %s148_s10, 0  ;;  %p240_p12 = scmp.lt.s32.totalorder (!%p210_p10), %s741_s22, 1  ;;  %v649_v0 = vld [vmem:[%s953_s1] sm:$0xff] (!%p210_p10)   ;;  %vm289_vm0 = vcmask (!%p210_p10), 31744   ;;  %v755_v2 = vmov (!%p210_p10), 0   ;;  %v257_v3 = vld [vmem:[%s954_s2 + $0x10] sm:$0xff] (!%p210_p10) }
  0x12   : > { %213 = sbr.rel (%p210_p10) target bundleno = 519 (0x207), region = 40  ;;  %p242_p13 = scmp.lt.s32.totalorder (!%p210_p10), %s737_s21, 1  ;;  %560 = vmatprep.mubr.msk.bf16.mxu0 (!%p210_p10), %vm289_vm0, %v649_v0  ;;  %v255_v1 = vld [vmem:[%s954_s2] sm:$0xff] (!%p210_p10)  ;;  %647 = vset.pattern.permute.xlu0 (!%p210_p10), %v755_v2  ;;  %v256_v4 = vld [vmem:[%s954_s2 + $0x8] sm:$0xff] (!%p210_p10)  ;;  %v258_v5 = vld [vmem:[%s954_s2 + $0x18] sm:$0xff] (!%p210_p10)  ;;  %vm296_vm1 = vcmask (!%p210_p10), 1041408  }
  0x13   : > { %s858_s11 = scalar_select %p149_p11, %s733_s20, %s151_s9  }
  0x14   : > { %648 = vset.pattern.permute.xlu1 (!%p210_p10), %v755_v2  ;;  %261 = vperm.xlu0 (!%p210_p10), %647, %v255_v1   ;;  %v388_v8 = vld [vmem:[%s956_s4] sm:$0xf] (!%p210_p10)  ;;  %v650_v10 = vld [vmem:[%s953_s1 + $0x8] sm:$0xff] (!%p210_p10)   ;;  %v756_v11 = vmov (!%p210_p10), 0.0   ;;  %vm757_vm2 = vmmov (!%p210_p10), 0   ;;  %vm394_vm3 = vcmask (!%p210_p10), 261120  }
  0x15   : > { %271 = vperm.xlu1 (!%p210_p10), %648, %v257_v3   ;;  %564 = vmatprep.subr.bf16.mxu1 (!%p210_p10), %v756_v11  ;;  %v385_v62 = vld [vmem:[%s955_s3] sm:$0x3] (!%p210_p10)  ;;  %s548_s9 = sshll.u32 (!%p210_p10), %s741_s22, 1  ;;  %s758_s26 = smov (!%p210_p10), [#allocation2]  }
  0x16   : > { %568 = vmatprep.mubr.msk.bf16.mxu1 (!%p210_p10), %vm757_vm2, %v756_v11  ;;  %s452_s10 = sadd.s32 (!%p210_p10), %s737_s21, %s548_s9  ;;  %s663_s27 = sshll.u32 (!%p210_p10), %s758_s26, 4  ;;  %s664_s27 = int_to_ptr.vmem [resolvable:$false] %s663_s27 }
  0x17   : > { %s549_s12 = sshll.u32 (!%p210_p10), %s452_s10, 5 }
  0x18   : > { %266 = vperm.xlu0 (!%p210_p10), %647, %v256_v4  }
  0x19   : > { %s241_s14 = scalar_select %p240_p12, %s741_s22, 1  ;;  %276 = vperm.xlu1 %648, %v258_v5  }
  0x1a   : > { %s243_s17 = scalar_select %p242_p13, %s737_s21, 1 }
  0x1b   : > { %s540_s30 = sshll.u32 %s241_s14, 1 }
  0x1c   : > { %s245_s8 = sadd.s32 %s540_s30, %s243_s17  ;;  %391 = vperm.xlu0 %647, %v388_v8   ;;  %s237_s30 = sand.u32 1, %s729_s19  }
  0x1d   : > { %s541_s15 = sshll.u32 %s245_s8, 2  ;;  %s539_s8 = sshll.u32 %s237_s30, 1 }
  0x1e   : > { %s247_s28 = scalar_lea.vmem %s952_s0, %s541_s15  ;;  %s239_s13 = scalar_lea.vmem [#allocation2], %s539_s8 }
  0x1f   : > { %v249_v6 = vld [vmem:[%s247_s28] sm:$0xf]  ;;  %s456_s15 = sshll.u32 %s239_s13, 4  ;;  %s899_s17 = scalar_lea.hbm %s957_s5, %s549_s12  ;;  %s901_s15 = int_to_ptr.vmem [resolvable:$true] %s456_s15 }
  0x20   : > { %v250_v7 = vpack.c.bf16 %v249_v6, %v249_v6  ;;  %s441_s21 = scalar_lea.sflag [#allocation3], %s237_s30  ;;  %s659_s22 = scalar_lea.vmem %s901_s15, 32 }
  0x21   : > { %p660_p0 = scmp.ne.s32.totalorder %s901_s15, %s659_s22  ;;  %s665_s28 = scalar_lea.vmem %s664_s27, 64 }
  0x22   : > { %572 = vmatprep.subr.msk.bf16.mxu0 %vm296_vm1, %v250_v7  ;;  %v298_v9 = vsel %vm296_vm1, %v250_v7, 0  ;;  %p666_p4 = scmp.lt.s32.totalorder %s901_s15, %s664_s27  ;;  %p667_p5 = scmp.lt.s32.totalorder %s665_s28, %s659_s22 }
  0x23   : > { %559 = vmatpush3.bf16.msra.mxu0 %v298_v9  ;;  %p661_p1 = pnand %p660_p0, %p840_p3 }
  0x24   : > { %p668_p6 = por %p667_p5, %p666_p4 }
  0x25   : > { %p662_p2 = pneg %p661_p1 }
  0x26   : > { %561 = vmatmul.mubr.msk.bf16.vlgmr.msra.gmra.mrb[0].mxu0 %vm289_vm0, %v650_v10 }
  0x27   : > { %p669_p7 = pnand %p668_p6, %p662_p2 }
  0x93   : > { %v262_v13 = vpop.permute.xlu0 %261 }
  0x94   : > { %v272_v12 = vpop.permute.xlu1 %271 }
  0x97   : > { %v267_v20 = vpop.permute.xlu0 %266 }
  0x98   : > { %v277_v15 = vpop.permute.xlu1 %276 }
  0x9b   : > { %v392_v63 = vpop.permute.xlu0 %391 }
  0xf9   : > { %v562_v14 = vpop.f32.mrb[0].mxu0 }
  0xfa   : > { %v343_v16 = vadd.f32 %v562_v14, %v272_v12  ;;  %v334_v17 = vpop.f32.mrb[1].mxu0 }
  0xfb   : > { %v335_v18 = vadd.f32 %v334_v17, %v262_v13  ;;  %v563_v19 = vpop.f32.mrb[2].mxu0 }
  0xfc   : > { %v355_v21 = vmul.f32 0.044715, %v343_v16  ;;  %v346_v22 = vadd.f32 %v563_v19, %v277_v15  ;;  %v337_v23 = vpop.f32.mrb[3].mxu0  ;;  %v351_v50 = vmul.f32 0.5, %v343_v16 }
  0xfd   : > { %v353_v24 = vmul.f32 0.044715, %v335_v18  ;;  %v338_v25 = vadd.f32 %v337_v23, %v267_v20  ;;  %v349_v53 = vmul.f32 0.5, %v335_v18 }
  0xfe   : > { %v359_v26 = vmul.f32 %v355_v21, %v343_v16  ;;  %v356_v27 = vmul.f32 0.044715, %v346_v22  ;;  %v352_v51 = vmul.f32 0.5, %v346_v22 }
  0xff   : > { %v357_v28 = vmul.f32 %v353_v24, %v335_v18  ;;  %v354_v29 = vmul.f32 0.044715, %v338_v25  ;;  %v350_v54 = vmul.f32 0.5, %v338_v25 }
 0x100   : > { %v363_v30 = vmul.f32 %v359_v26, %v343_v16  ;;  %v360_v31 = vmul.f32 %v356_v27, %v346_v22 }
 0x101   : > { %v358_v32 = vmul.f32 %v354_v29, %v338_v25  ;;  %v361_v33 = vmul.f32 %v357_v28, %v335_v18 }
 0x102   : > { %v364_v34 = vmul.f32 %v360_v31, %v346_v22  ;;  %v367_v35 = vadd.f32 %v363_v30, %v343_v16 }
 0x103   : > { %v362_v36 = vmul.f32 %v358_v32, %v338_v25  ;;  %v365_v37 = vadd.f32 %v361_v33, %v335_v18 }
 0x104   : > { %v368_v38 = vadd.f32 %v364_v34, %v346_v22  ;;  %v371_v39 = vmul.f32 0.7978846, %v367_v35 }
 0x105   : > { %v366_v40 = vadd.f32 %v362_v36, %v338_v25  ;;  %v369_v41 = vmul.f32 0.7978846, %v365_v37 }
 0x106   : > { %v372_v42 = vmul.f32 0.7978846, %v368_v38  ;;  %651 = vtanh.f32 %v371_v39 }
 0x107   : > { %v370_v43 = vmul.f32 0.7978846, %v366_v40  ;;  %653 = vtanh.f32 %v369_v41 }
 0x108   : > { %655 = vtanh.f32 %v372_v42 }
 0x109   : > { %657 = vtanh.f32 %v370_v43 }
 0x110   : > { %v652_v44 = vpop.eup %651 }
 0x111   : > { %v654_v45 = vpop.eup %653  ;;  %v379_v46 = vadd.f32 1.0, %v652_v44 }
 0x112   : > { %v656_v47 = vpop.eup %655  ;;  %v377_v48 = vadd.f32 1.0, %v654_v45 }
 0x113   : > { %v658_v49 = vpop.eup %657  ;;  %v380_v52 = vadd.f32 1.0, %v656_v47  ;;  %v383_v56 = vmul.f32 %v379_v46, %v351_v50 }
 0x114   : > { %v378_v55 = vadd.f32 1.0, %v658_v49  ;;  %v381_v58 = vmul.f32 %v377_v48, %v349_v53 }
 0x115   : > { %v384_v57 = vmul.f32 %v380_v52, %v352_v51 }
 0x116   : > { %v382_v59 = vmul.f32 %v378_v55, %v350_v54 }
 0x117   : > { %v387_v60 = vpack.c.bf16 %v384_v57, %v383_v56 }
 0x118   : > { %v386_v61 = vpack.c.bf16 %v382_v59, %v381_v58 }
 0x11a   : > { %565 = vmatpush3.bf16.msra.mxu1 %v386_v61 }
 0x11b   : > { %566 = vmatprep.subr.bf16.mxu1 %v756_v11 }
 0x11e   : > { %567 = vmatpush3.bf16.msra.mxu1 %v387_v60 }
 0x121   : > { %569 = vmatmul.mubr.msk.bf16.vlgmr.msra.gmra.mrb[0].mxu1 %vm394_vm3, %v385_v62 }
 0x1f4   : > { %v432_v0 = vpop.f32.mrb[0].mxu1 }
 0x1f5   : > { %v433_v1 = vadd.f32 %v432_v0, %v392_v63  ;;  %v570_v2 = vpop.f32.mrb[1].mxu1 }
 0x1f6   : > { %v435_v3 = vpop.f32.mrb[2].mxu1 }
 0x1f7   : > { %v438_v4 = vpack.c.bf16 %v433_v1, %v433_v1  ;;  %v571_v5 = vpop.f32.mrb[3].mxu1 }
 0x1f9   : > { %439 = vst [vmem:[%s239_s13] sm:$0x3] %v438_v4 }
 0x1fa   : > { %672 = shalt.err (!%p669_p7)
}
 0x1fb   : > { %s673_s29 = scalar_lea.hbm %s899_s17, 32  ;;  %s677_s9 = scalar_lea.hbm %s957_s5, 128 }
 0x1fc   : > { %p674_p9 = scmp.ne.s32.totalorder %s899_s17, %s673_s29  ;;  %p678_p12 = scmp.lt.u32.totalorder %s899_s17, %s957_s5 }
 0x1fd   : > { %p679_p13 = scmp.lt.u32.totalorder %s677_s9, %s673_s29  ;;  %p681_p1 = scmp.lt.u32.totalorder %s673_s29, %s899_s17 }
 0x1fe   : > { %p675_p10 = pnand %p674_p9, %p840_p3 }
 0x1ff   : > { %p680_p0 = por %p679_p13, %p678_p12 }
 0x200   : > { %p676_p11 = pneg %p675_p10 }
 0x201   : > { %p682_p2 = por %p681_p1, %p680_p0 }
 0x203   : > { %p683_p4 = pnand %p682_p2, %p676_p11 }
 0x205   : > { %686 = shalt.err (!%p683_p4)
}
 0x206   : > { %573 = dma.vmem_to_hbm [thread:$0]  (%p840_p3), %s901_s15, 32, %s899_s17, %s441_s21  }
 0x207 PF: > { %p579_p5 = scmp.ge.s32.totalorder %s753_s25, 2  ;;  %s468_s13 = sand.u32 1, %s725_s18  }
 0x208   : > { %s469_s16 = scalar_lea.sflag [#allocation3], %s468_s13 }
 0x209   : > { %p576_p6 = pnand %p579_p5, %p849_p8 }
 0x20b   : > { %720 = dma.done.wait (!%p576_p6), %s469_s16, 32  }
 0x20c   : > { %722 = vsyncadd (!%p576_p6), %s469_s16, 4294967264  ;;  %s18_s25 = sadd.s32 1, %s753_s25   ;;  %s964_s6 = sld [smem:[#allocation5_spill]] }
 0x20d   : > { %p15_p7 = scmp.ge.s32.totalorder %s18_s25, 6   ;;  %s965_s15 = sld [smem:[#allocation6_spill]] }
 0x20e   : > { %s966_s18 = smov %s729_s19  ;;  %s967_s19 = smov %s733_s20 }
 0x20f   : > { %s968_s20 = smov %s858_s11  ;;  %s969_s21 = smov %s745_s23 }
 0x210   : > { %s970_s22 = smov %s749_s24  ;;  %17 = sbr.rel (!%p15_p7) target bundleno = 5 (0x5), region = 75 }
 0x212   : > { %s971_s23 = smov %s964_s6 }
 0x213   : > { %s972_s24 = smov %s965_s15 }
 0x217   :  { %474 = vsyncpa [#allocation3], 1 }
 0x218   :  { %476 = vsyncpa [#allocation3 + $0x1], 1 }

</bundles_post_ra>
